<compile_context>
chip_gen: v7x
topology: tpu7x:2x2x1
jax: 0.10.0
libtpu: 0.0.40
codegen_flags: <defaults>
</compile_context>

<pallas_src>
import functools

import jax
import jax.numpy as jnp
import numpy as np
from jax.experimental import pallas as pl
from jax.experimental.pallas import tpu as pltpu


# ----------------------------------------------------------------------------
# Pallas kernel: one batch element per grid step, lane axis = time (L).
# ----------------------------------------------------------------------------
def temporal_block_kernel(x_ref, w1s_ref, w1zd_ref, b1_ref, w2_ref, b2_ref,
                          bd_ref, o_ref, h1_ref, res_ref, *, K, dilation):
    _, L = x_ref.shape
    C_out = o_ref.shape[0]
    cdt = x_ref.dtype
    f32 = jnp.float32

    x = x_ref[...]                                              # (C_in, L), compute dtype

    # ---- stage 1: conv1 unshifted tap FUSED with the 1x1 downsample --------
    # w1zd = [W1[:, :, K-1] ; Wd] stacked on output rows: one MXU push covers
    # the s=0 conv1 tap and the whole residual path.
    pz = jnp.dot(w1zd_ref[...], x, preferred_element_type=f32)  # (2*C_out, L)
    h1_ref[...] = pz[:C_out, :] + b1_ref[...]                   # conv1 s=0 tap + bias
    res_ref[...] = pz[C_out:, :] + bd_ref[...]                  # downsample + bias

    # Remaining conv1 taps: causal delay by s = (K-1-k)*dilation, accumulated
    # into the f32 VMEM accumulator via static sliced stores (operand stays 1x
    # in registers; each per-tap product retires immediately).
    for k in range(K - 1):                                      # K is tiny & static
        s = (K - 1 - k) * dilation
        pk = jnp.dot(w1s_ref[k], x, preferred_element_type=f32)  # (C_out, L)
        h1_ref[:, s:] += pk[:, :L - s]
    h1_ref[...] = jnp.maximum(h1_ref[...], 0.0)                 # relu1 (dropout1 = id, eval)

    # ---- stage 2: conv2 on h1 (read back from VMEM; stage-1 regs retired) --
    h1 = h1_ref[...].astype(cdt)
    o_ref[...] = (jnp.dot(w2_ref[K - 1], h1, preferred_element_type=f32)
                  + b2_ref[...])                                # s=0 tap + bias
    for k in range(K - 1):
        s = (K - 1 - k) * dilation
        pk = jnp.dot(w2_ref[k], h1, preferred_element_type=f32)
        o_ref[:, s:] += pk[:, :L - s]

    # relu2 (dropout2 = id), residual add, final relu -> lane-dense store.
    o_ref[...] = jnp.maximum(jnp.maximum(o_ref[...], 0.0) + res_ref[...], 0.0)


# ----------------------------------------------------------------------------
# Wrapper: weight re-layout (tiny, one-time) + pallas_call.  No activation
# transposes: x stays in the PyTorch NCL layout and so does the output.
# ----------------------------------------------------------------------------
def temporal_block_forward(x_ncl, w1_oik, b1, w2_oik, b2, wd_oik, bd, *,
                           kernel_size, stride, dilation, padding,
                           compute_dtype=jnp.float32):
    assert stride == 1, "TCN TemporalBlock uses stride=1"
    assert padding == (kernel_size - 1) * dilation, \
        "chomp(padding) is causal only when padding == (K-1)*dilation"
    K = kernel_size
    assert K >= 2, "TCN block expects kernel_size >= 2"
    N, C_in, L = x_ncl.shape
    C_out = w1_oik.shape[0]
    assert (K - 1) * dilation < L

    cdt = compute_dtype
    # Tap-major weights: tap k multiplies x delayed by (K-1-k)*dilation steps.
    w1_tap = jnp.moveaxis(w1_oik, 2, 0)                          # (K, C_out, C_in)
    w2_tap = jnp.moveaxis(w2_oik, 2, 0).astype(cdt)              # (K, C_out, C_out)
    w1s = w1_tap[:K - 1].astype(cdt)                             # shifted taps only
    # Fused stage-1 weights for the unshifted tap: [W1 tap K-1 ; Wd].
    w1zd = jnp.concatenate([w1_tap[K - 1], wd_oik[:, :, 0]],
                           axis=0).astype(cdt)                   # (2*C_out, C_in)
    b1c = b1.reshape(C_out, 1).astype(jnp.float32)
    b2c = b2.reshape(C_out, 1).astype(jnp.float32)
    bdc = bd.reshape(C_out, 1).astype(jnp.float32)
    x = x_ncl.astype(cdt)                                        # native NCL; bf16 stream if enabled

    kern = functools.partial(temporal_block_kernel, K=K, dilation=dilation)

    wbytes = jnp.dtype(cdt).itemsize
    flops = 2 * N * L * (K * C_in * C_out + K * C_out * C_out + C_in * C_out)
    bytes_accessed = (wbytes * N * C_in * L + 4 * N * C_out * L
                      + wbytes * (K * C_in * C_out + K * C_out * C_out + C_in * C_out)
                      + 4 * 3 * C_out)
    cost = pl.CostEstimate(flops=int(flops), transcendentals=0,
                           bytes_accessed=int(bytes_accessed))

    return pl.pallas_call(
        kern,
        out_shape=jax.ShapeDtypeStruct((N, C_out, L), jnp.float32),
        grid_spec=pltpu.PrefetchScalarGridSpec(
            num_scalar_prefetch=0,
            grid=(N,),                                    # >= 2 blocks: both v7x TCs busy, pipeline alive
            in_specs=[
                pl.BlockSpec((None, C_in, L), lambda i: (i, 0, 0)),       # x, lane-dense in L
                pl.BlockSpec((K - 1, C_out, C_in), lambda i: (0, 0, 0)),  # W1 shifted taps
                pl.BlockSpec((2 * C_out, C_in), lambda i: (0, 0)),        # [W1 s=0 tap ; Wd]
                pl.BlockSpec((C_out, 1), lambda i: (0, 0)),               # b1
                pl.BlockSpec((K, C_out, C_out), lambda i: (0, 0, 0)),     # W2 (all taps)
                pl.BlockSpec((C_out, 1), lambda i: (0, 0)),               # b2
                pl.BlockSpec((C_out, 1), lambda i: (0, 0)),               # bd
            ],
            out_specs=pl.BlockSpec((None, C_out, L), lambda i: (i, 0, 0)),
            scratch_shapes=[pltpu.VMEM((C_out, L), jnp.float32),          # h1 staging / f32 acc
                            pltpu.VMEM((C_out, L), jnp.float32)],         # residual staging
        ),
        compiler_params=pltpu.CompilerParams(
            dimension_semantics=("parallel",),
            vmem_limit_bytes=32 * 1024 * 1024),
        cost_estimate=cost,
    )(x, w1s, w1zd, b1c, w2_tap, b2c, bdc)


# ----------------------------------------------------------------------------
# Pure-JAX reference (lax.conv_general_dilated) for the correctness check
# ----------------------------------------------------------------------------
def reference_forward(x_ncl, w1_oik, b1, w2_oik, b2, wd_oik, bd,
                      *, stride, padding, dilation):
    def conv1d(x, w, b, p, d):
        y = jax.lax.conv_general_dilated(
            x, w, window_strides=(stride,), padding=[(p, p)],
            rhs_dilation=(d,), dimension_numbers=('NCH', 'OIH', 'NCH'))
        return y + b[None, :, None]

    out = conv1d(x_ncl, w1_oik, b1, padding, dilation)[:, :, :-padding]
    out = jax.nn.relu(out)
    out = conv1d(out, w2_oik, b2, padding, dilation)[:, :, :-padding]
    out = jax.nn.relu(out)
    res = conv1d(x_ncl, wd_oik, bd, 0, 1)
    return jax.nn.relu(out + res)


def weight_norm_effective(v, g):
    # PyTorch weight_norm(dim=0): w = g * v / ||v||, norm over all dims but 0.
    nrm = jnp.sqrt(jnp.sum(v * v, axis=(1, 2), keepdims=True))
    return g[:, None, None] * v / nrm


if __name__ == "__main__":
    # Small shapes consistent with the module; L=128 keeps the demo lane-dense.
    N, C_in, C_out, L = 4, 4, 8, 128
    K, stride, dilation = 3, 1, 2
    padding = (K - 1) * dilation            # 4, standard TCN causal padding

    key = jax.random.PRNGKey(0)
    k = jax.random.split(key, 9)

    # conv1: weight_norm(Conv1d(C_in, C_out, K))  -> v, g, bias
    v1 = 0.01 * jax.random.normal(k[0], (C_out, C_in, K), jnp.float32)
    g1 = 0.5 + jnp.abs(jax.random.normal(k[1], (C_out,), jnp.float32))
    b1 = 0.1 * jax.random.normal(k[2], (C_out,), jnp.float32)
    w1_oik = weight_norm_effective(v1, g1)                    # (O, I, K)

    # conv2: weight_norm(Conv1d(C_out, C_out, K))
    v2 = 0.01 * jax.random.normal(k[3], (C_out, C_out, K), jnp.float32)
    g2 = 0.5 + jnp.abs(jax.random.normal(k[4], (C_out,), jnp.float32))
    b2 = 0.1 * jax.random.normal(k[5], (C_out,), jnp.float32)
    w2_oik = weight_norm_effective(v2, g2)

    # downsample: Conv1d(C_in, C_out, 1) (present because n_inputs != n_outputs)
    wd_oik = 0.01 * jax.random.normal(k[6], (C_out, C_in, 1), jnp.float32)
    bd = 0.1 * jax.random.normal(k[7], (C_out,), jnp.float32)

    # Input in PyTorch NCL layout (used natively by the kernel — no transposes)
    x = jax.random.normal(k[8], (N, C_in, L), jnp.float32)

    y_ref = reference_forward(x, w1_oik, b1, w2_oik, b2, wd_oik, bd,
                              stride=stride, padding=padding, dilation=dilation)

    # f32 MXU operands: tight numerical check.
    y32 = temporal_block_forward(x, w1_oik, b1, w2_oik, b2, wd_oik, bd,
                                 kernel_size=K, stride=stride,
                                 dilation=dilation, padding=padding,
                                 compute_dtype=jnp.float32)
    y32 = jax.block_until_ready(y32)
    np.testing.assert_allclose(np.asarray(y32), np.asarray(y_ref),
                               atol=1e-4, rtol=1e-4)

    # bf16 MXU operands (production setting on v5e/v6e/v7x; f32 accumulate).
    # Tolerance reflects operand quantization only, not a kernel bug.
    ybf = temporal_block_forward(x, w1_oik, b1, w2_oik, b2, wd_oik, bd,
                                 kernel_size=K, stride=stride,
                                 dilation=dilation, padding=padding,
                                 compute_dtype=jnp.bfloat16)
    ybf = jax.block_until_ready(ybf)
    np.testing.assert_allclose(np.asarray(ybf, dtype=np.float32),
                               np.asarray(y_ref), atol=1e-1, rtol=1e-1)

    print("KERNEL_OK")
</pallas_src>

<mosaic_0001>
module attributes {stable_mosaic.version = 11 : i64} {
  func.func @temporal_block_kernel(%arg0: i32, %arg1: memref<1x4x128xf32, #tpu.memory_space<vmem>>, %arg2: memref<2x8x4xf32, #tpu.memory_space<vmem>>, %arg3: memref<16x4xf32, #tpu.memory_space<vmem>>, %arg4: memref<8x1xf32, #tpu.memory_space<vmem>>, %arg5: memref<3x8x8xf32, #tpu.memory_space<vmem>>, %arg6: memref<8x1xf32, #tpu.memory_space<vmem>>, %arg7: memref<8x1xf32, #tpu.memory_space<vmem>>, %arg8: memref<1x8x128xf32, #tpu.memory_space<vmem>>, %arg9: memref<8x128xf32, #tpu.memory_space<vmem>>, %arg10: memref<8x128xf32, #tpu.memory_space<vmem>>) attributes {dimension_semantics = [#tpu.dimension_semantics<parallel>], iteration_bounds = array<i64: 4>, scalar_prefetch = 0 : i64, scratch_operands = 2 : i64, tpu.core_type = #tpu.core_type<tc>, window_params = [{transform_indices = @transform_0, window_bounds = array<i64: 1, 4, 128>}, {pipeline_mode = #tpu.pipeline_mode<synchronous>, transform_indices = @transform_1, window_bounds = array<i64: 2, 8, 4>}, {pipeline_mode = #tpu.pipeline_mode<synchronous>, transform_indices = @transform_2, window_bounds = array<i64: 16, 4>}, {pipeline_mode = #tpu.pipeline_mode<synchronous>, transform_indices = @transform_3, window_bounds = array<i64: 8, 1>}, {pipeline_mode = #tpu.pipeline_mode<synchronous>, transform_indices = @transform_4, window_bounds = array<i64: 3, 8, 8>}, {pipeline_mode = #tpu.pipeline_mode<synchronous>, transform_indices = @transform_5, window_bounds = array<i64: 8, 1>}, {pipeline_mode = #tpu.pipeline_mode<synchronous>, transform_indices = @transform_6, window_bounds = array<i64: 8, 1>}, {transform_indices = @transform_7, window_bounds = array<i64: 1, 8, 128>}]} {
    %c0 = arith.constant 0 : index
    %c0_0 = arith.constant 0 : index
    %c0_1 = arith.constant 0 : index
    %0 = vector.load %arg1[%c0, %c0_0, %c0_1] : memref<1x4x128xf32, #tpu.memory_space<vmem>>, vector<1x4x128xf32>
    %1 = vector.shape_cast %0 : vector<1x4x128xf32> to vector<4x128xf32>
    %c0_2 = arith.constant 0 : index
    %c0_3 = arith.constant 0 : index
    %2 = vector.load %arg3[%c0_2, %c0_3] : memref<16x4xf32, #tpu.memory_space<vmem>>, vector<16x4xf32>
    %cst = arith.constant dense<0.000000e+00> : vector<16x128xf32>
    %3 = tpu.matmul %2, %1, %cst {dimension_numbers = #tpu.dot_dimension_numbers<[1], [0], [0], [1], [0, 0, 1, 1], [], []>} : vector<16x4xf32>, vector<4x128xf32>, vector<16x128xf32> -> vector<16x128xf32>
    %4 = vector.extract_strided_slice %3 {offsets = [0, 0], sizes = [8, 128], strides = [1, 1]} : vector<16x128xf32> to vector<8x128xf32>
    %c0_4 = arith.constant 0 : index
    %c0_5 = arith.constant 0 : index
    %5 = vector.load %arg4[%c0_4, %c0_5] : memref<8x1xf32, #tpu.memory_space<vmem>>, vector<8x1xf32>
    %6 = vector.broadcast %5 : vector<8x1xf32> to vector<8x128xf32>
    %7 = arith.addf %4, %6 : vector<8x128xf32>
    %c0_6 = arith.constant 0 : index
    %c0_7 = arith.constant 0 : index
    %8 = vector.load %arg9[%c0_6, %c0_7] : memref<8x128xf32, #tpu.memory_space<vmem>>, vector<8x128xf32>
    tpu.vector_store %arg9[%c0_6, %c0_7], %7 {strides = array<i32>} : memref<8x128xf32, #tpu.memory_space<vmem>>, vector<8x128xf32>,
    %9 = vector.extract_strided_slice %3 {offsets = [8, 0], sizes = [8, 128], strides = [1, 1]} : vector<16x128xf32> to vector<8x128xf32>
    %c0_8 = arith.constant 0 : index
    %c0_9 = arith.constant 0 : index
    %10 = vector.load %arg7[%c0_8, %c0_9] : memref<8x1xf32, #tpu.memory_space<vmem>>, vector<8x1xf32>
    %11 = vector.broadcast %10 : vector<8x1xf32> to vector<8x128xf32>
    %12 = arith.addf %9, %11 : vector<8x128xf32>
    %c0_10 = arith.constant 0 : index
    %c0_11 = arith.constant 0 : index
    %13 = vector.load %arg10[%c0_10, %c0_11] : memref<8x128xf32, #tpu.memory_space<vmem>>, vector<8x128xf32>
    tpu.vector_store %arg10[%c0_10, %c0_11], %12 {strides = array<i32>} : memref<8x128xf32, #tpu.memory_space<vmem>>, vector<8x128xf32>,
    %c0_12 = arith.constant 0 : index
    %c0_13 = arith.constant 0 : index
    %c0_14 = arith.constant 0 : index
    %14 = vector.load %arg2[%c0_12, %c0_13, %c0_14] : memref<2x8x4xf32, #tpu.memory_space<vmem>>, vector<1x8x4xf32>
    %15 = vector.shape_cast %14 : vector<1x8x4xf32> to vector<8x4xf32>
    %cst_15 = arith.constant dense<0.000000e+00> : vector<8x128xf32>
    %16 = tpu.matmul %15, %1, %cst_15 {dimension_numbers = #tpu.dot_dimension_numbers<[1], [0], [0], [1], [0, 0, 1, 1], [], []>} : vector<8x4xf32>, vector<4x128xf32>, vector<8x128xf32> -> vector<8x128xf32>
    %c0_16 = arith.constant 0 : index
    %c4 = arith.constant 4 : index
    %17 = vector.load %arg9[%c0_16, %c4] : memref<8x128xf32, #tpu.memory_space<vmem>>, vector<8x124xf32>
    %18 = vector.extract_strided_slice %16 {offsets = [0, 0], sizes = [8, 124], strides = [1, 1]} : vector<8x128xf32> to vector<8x124xf32>
    %19 = arith.addf %17, %18 : vector<8x124xf32>
    %c0_17 = arith.constant 0 : index
    %c4_18 = arith.constant 4 : index
    %20 = vector.load %arg9[%c0_17, %c4_18] : memref<8x128xf32, #tpu.memory_space<vmem>>, vector<8x124xf32>
    tpu.vector_store %arg9[%c0_17, %c4_18], %19 {strides = array<i32>} : memref<8x128xf32, #tpu.memory_space<vmem>>, vector<8x124xf32>,
    %c1 = arith.constant 1 : index
    %c0_19 = arith.constant 0 : index
    %c0_20 = arith.constant 0 : index
    %21 = vector.load %arg2[%c1, %c0_19, %c0_20] : memref<2x8x4xf32, #tpu.memory_space<vmem>>, vector<1x8x4xf32>
    %22 = vector.shape_cast %21 : vector<1x8x4xf32> to vector<8x4xf32>
    %cst_21 = arith.constant dense<0.000000e+00> : vector<8x128xf32>
    %23 = tpu.matmul %22, %1, %cst_21 {dimension_numbers = #tpu.dot_dimension_numbers<[1], [0], [0], [1], [0, 0, 1, 1], [], []>} : vector<8x4xf32>, vector<4x128xf32>, vector<8x128xf32> -> vector<8x128xf32>
    %c0_22 = arith.constant 0 : index
    %c2 = arith.constant 2 : index
    %24 = vector.load %arg9[%c0_22, %c2] : memref<8x128xf32, #tpu.memory_space<vmem>>, vector<8x126xf32>
    %25 = vector.extract_strided_slice %23 {offsets = [0, 0], sizes = [8, 126], strides = [1, 1]} : vector<8x128xf32> to vector<8x126xf32>
    %26 = arith.addf %24, %25 : vector<8x126xf32>
    %c0_23 = arith.constant 0 : index
    %c2_24 = arith.constant 2 : index
    %27 = vector.load %arg9[%c0_23, %c2_24] : memref<8x128xf32, #tpu.memory_space<vmem>>, vector<8x126xf32>
    tpu.vector_store %arg9[%c0_23, %c2_24], %26 {strides = array<i32>} : memref<8x128xf32, #tpu.memory_space<vmem>>, vector<8x126xf32>,
    %c0_25 = arith.constant 0 : index
    %c0_26 = arith.constant 0 : index
    %28 = vector.load %arg9[%c0_25, %c0_26] : memref<8x128xf32, #tpu.memory_space<vmem>>, vector<8x128xf32>
    %cst_27 = arith.constant 0.000000e+00 : f32
    %29 = vector.broadcast %cst_27 : f32 to vector<8x128xf32>
    %30 = arith.maximumf %28, %29 : vector<8x128xf32>
    %c0_28 = arith.constant 0 : index
    %c0_29 = arith.constant 0 : index
    %31 = vector.load %arg9[%c0_28, %c0_29] : memref<8x128xf32, #tpu.memory_space<vmem>>, vector<8x128xf32>
    tpu.vector_store %arg9[%c0_28, %c0_29], %30 {strides = array<i32>} : memref<8x128xf32, #tpu.memory_space<vmem>>, vector<8x128xf32>,
    %c0_30 = arith.constant 0 : index
    %c0_31 = arith.constant 0 : index
    %32 = vector.load %arg9[%c0_30, %c0_31] : memref<8x128xf32, #tpu.memory_space<vmem>>, vector<8x128xf32>
    %c2_32 = arith.constant 2 : index
    %c0_33 = arith.constant 0 : index
    %c0_34 = arith.constant 0 : index
    %33 = vector.load %arg5[%c2_32, %c0_33, %c0_34] : memref<3x8x8xf32, #tpu.memory_space<vmem>>, vector<1x8x8xf32>
    %34 = vector.shape_cast %33 : vector<1x8x8xf32> to vector<8x8xf32>
    %cst_35 = arith.constant dense<0.000000e+00> : vector<8x128xf32>
    %35 = tpu.matmul %34, %32, %cst_35 {dimension_numbers = #tpu.dot_dimension_numbers<[1], [0], [0], [1], [0, 0, 1, 1], [], []>} : vector<8x8xf32>, vector<8x128xf32>, vector<8x128xf32> -> vector<8x128xf32>
    %c0_36 = arith.constant 0 : index
    %c0_37 = arith.constant 0 : index
    %36 = vector.load %arg6[%c0_36, %c0_37] : memref<8x1xf32, #tpu.memory_space<vmem>>, vector<8x1xf32>
    %37 = vector.broadcast %36 : vector<8x1xf32> to vector<8x128xf32>
    %38 = arith.addf %35, %37 : vector<8x128xf32>
    %c0_38 = arith.constant 0 : index
    %c0_39 = arith.constant 0 : index
    %c0_40 = arith.constant 0 : index
    %39 = vector.load %arg8[%c0_38, %c0_39, %c0_40] : memref<1x8x128xf32, #tpu.memory_space<vmem>>, vector<1x8x128xf32>
    %40 = vector.shape_cast %39 : vector<1x8x128xf32> to vector<8x128xf32>
    %41 = vector.shape_cast %38 : vector<8x128xf32> to vector<1x8x128xf32>
    tpu.vector_store %arg8[%c0_38, %c0_39, %c0_40], %41 {strides = array<i32>} : memref<1x8x128xf32, #tpu.memory_space<vmem>>, vector<1x8x128xf32>,
    %c0_41 = arith.constant 0 : index
    %c0_42 = arith.constant 0 : index
    %c0_43 = arith.constant 0 : index
    %42 = vector.load %arg5[%c0_41, %c0_42, %c0_43] : memref<3x8x8xf32, #tpu.memory_space<vmem>>, vector<1x8x8xf32>
    %43 = vector.shape_cast %42 : vector<1x8x8xf32> to vector<8x8xf32>
    %cst_44 = arith.constant dense<0.000000e+00> : vector<8x128xf32>
    %44 = tpu.matmul %43, %32, %cst_44 {dimension_numbers = #tpu.dot_dimension_numbers<[1], [0], [0], [1], [0, 0, 1, 1], [], []>} : vector<8x8xf32>, vector<8x128xf32>, vector<8x128xf32> -> vector<8x128xf32>
    %c0_45 = arith.constant 0 : index
    %c0_46 = arith.constant 0 : index
    %c4_47 = arith.constant 4 : index
    %45 = vector.load %arg8[%c0_45, %c0_46, %c4_47] : memref<1x8x128xf32, #tpu.memory_space<vmem>>, vector<1x8x124xf32>
    %46 = vector.shape_cast %45 : vector<1x8x124xf32> to vector<8x124xf32>
    %47 = vector.extract_strided_slice %44 {offsets = [0, 0], sizes = [8, 124], strides = [1, 1]} : vector<8x128xf32> to vector<8x124xf32>
    %48 = arith.addf %46, %47 : vector<8x124xf32>
    %c0_48 = arith.constant 0 : index
    %c0_49 = arith.constant 0 : index
    %c4_50 = arith.constant 4 : index
    %49 = vector.load %arg8[%c0_48, %c0_49, %c4_50] : memref<1x8x128xf32, #tpu.memory_space<vmem>>, vector<1x8x124xf32>
    %50 = vector.shape_cast %49 : vector<1x8x124xf32> to vector<8x124xf32>
    %51 = vector.shape_cast %48 : vector<8x124xf32> to vector<1x8x124xf32>
    tpu.vector_store %arg8[%c0_48, %c0_49, %c4_50], %51 {strides = array<i32>} : memref<1x8x128xf32, #tpu.memory_space<vmem>>, vector<1x8x124xf32>,
    %c1_51 = arith.constant 1 : index
    %c0_52 = arith.constant 0 : index
    %c0_53 = arith.constant 0 : index
    %52 = vector.load %arg5[%c1_51, %c0_52, %c0_53] : memref<3x8x8xf32, #tpu.memory_space<vmem>>, vector<1x8x8xf32>
    %53 = vector.shape_cast %52 : vector<1x8x8xf32> to vector<8x8xf32>
    %cst_54 = arith.constant dense<0.000000e+00> : vector<8x128xf32>
    %54 = tpu.matmul %53, %32, %cst_54 {dimension_numbers = #tpu.dot_dimension_numbers<[1], [0], [0], [1], [0, 0, 1, 1], [], []>} : vector<8x8xf32>, vector<8x128xf32>, vector<8x128xf32> -> vector<8x128xf32>
    %c0_55 = arith.constant 0 : index
    %c0_56 = arith.constant 0 : index
    %c2_57 = arith.constant 2 : index
    %55 = vector.load %arg8[%c0_55, %c0_56, %c2_57] : memref<1x8x128xf32, #tpu.memory_space<vmem>>, vector<1x8x126xf32>
    %56 = vector.shape_cast %55 : vector<1x8x126xf32> to vector<8x126xf32>
    %57 = vector.extract_strided_slice %54 {offsets = [0, 0], sizes = [8, 126], strides = [1, 1]} : vector<8x128xf32> to vector<8x126xf32>
    %58 = arith.addf %56, %57 : vector<8x126xf32>
    %c0_58 = arith.constant 0 : index
    %c0_59 = arith.constant 0 : index
    %c2_60 = arith.constant 2 : index
    %59 = vector.load %arg8[%c0_58, %c0_59, %c2_60] : memref<1x8x128xf32, #tpu.memory_space<vmem>>, vector<1x8x126xf32>
    %60 = vector.shape_cast %59 : vector<1x8x126xf32> to vector<8x126xf32>
    %61 = vector.shape_cast %58 : vector<8x126xf32> to vector<1x8x126xf32>
    tpu.vector_store %arg8[%c0_58, %c0_59, %c2_60], %61 {strides = array<i32>} : memref<1x8x128xf32, #tpu.memory_space<vmem>>, vector<1x8x126xf32>,
    %c0_61 = arith.constant 0 : index
    %c0_62 = arith.constant 0 : index
    %c0_63 = arith.constant 0 : index
    %62 = vector.load %arg8[%c0_61, %c0_62, %c0_63] : memref<1x8x128xf32, #tpu.memory_space<vmem>>, vector<1x8x128xf32>
    %63 = vector.shape_cast %62 : vector<1x8x128xf32> to vector<8x128xf32>
    %cst_64 = arith.constant 0.000000e+00 : f32
    %64 = vector.broadcast %cst_64 : f32 to vector<8x128xf32>
    %65 = arith.maximumf %63, %64 : vector<8x128xf32>
    %c0_65 = arith.constant 0 : index
    %c0_66 = arith.constant 0 : index
    %66 = vector.load %arg10[%c0_65, %c0_66] : memref<8x128xf32, #tpu.memory_space<vmem>>, vector<8x128xf32>
    %67 = arith.addf %65, %66 : vector<8x128xf32>
    %cst_67 = arith.constant 0.000000e+00 : f32
    %68 = vector.broadcast %cst_67 : f32 to vector<8x128xf32>
    %69 = arith.maximumf %67, %68 : vector<8x128xf32>
    %c0_68 = arith.constant 0 : index
    %c0_69 = arith.constant 0 : index
    %c0_70 = arith.constant 0 : index
    %70 = vector.load %arg8[%c0_68, %c0_69, %c0_70] : memref<1x8x128xf32, #tpu.memory_space<vmem>>, vector<1x8x128xf32>
    %71 = vector.shape_cast %70 : vector<1x8x128xf32> to vector<8x128xf32>
    %72 = vector.shape_cast %69 : vector<8x128xf32> to vector<1x8x128xf32>
    tpu.vector_store %arg8[%c0_68, %c0_69, %c0_70], %72 {strides = array<i32>} : memref<1x8x128xf32, #tpu.memory_space<vmem>>, vector<1x8x128xf32>,
    return
  }
  func.func @transform_0(%arg0: i32) -> (i32, i32, i32) {
    %c0_i32 = arith.constant 0 : i32
    %c0_i32_0 = arith.constant 0 : i32
    %c0_i32_1 = arith.constant 0 : i32
    return %arg0, %c0_i32, %c0_i32_0 : i32, i32, i32
  }
  func.func @transform_1(%arg0: i32) -> (i32, i32, i32) {
    %c0_i32 = arith.constant 0 : i32
    %c0_i32_0 = arith.constant 0 : i32
    %c0_i32_1 = arith.constant 0 : i32
    %c0_i32_2 = arith.constant 0 : i32
    return %c0_i32, %c0_i32_0, %c0_i32_1 : i32, i32, i32
  }
  func.func @transform_2(%arg0: i32) -> (i32, i32) {
    %c0_i32 = arith.constant 0 : i32
    %c0_i32_0 = arith.constant 0 : i32
    %c0_i32_1 = arith.constant 0 : i32
    return %c0_i32, %c0_i32_0 : i32, i32
  }
  func.func @transform_3(%arg0: i32) -> (i32, i32) {
    %c0_i32 = arith.constant 0 : i32
    %c0_i32_0 = arith.constant 0 : i32
    %c0_i32_1 = arith.constant 0 : i32
    return %c0_i32, %c0_i32_0 : i32, i32
  }
  func.func @transform_4(%arg0: i32) -> (i32, i32, i32) {
    %c0_i32 = arith.constant 0 : i32
    %c0_i32_0 = arith.constant 0 : i32
    %c0_i32_1 = arith.constant 0 : i32
    %c0_i32_2 = arith.constant 0 : i32
    return %c0_i32, %c0_i32_0, %c0_i32_1 : i32, i32, i32
  }
  func.func @transform_5(%arg0: i32) -> (i32, i32) {
    %c0_i32 = arith.constant 0 : i32
    %c0_i32_0 = arith.constant 0 : i32
    %c0_i32_1 = arith.constant 0 : i32
    return %c0_i32, %c0_i32_0 : i32, i32
  }
  func.func @transform_6(%arg0: i32) -> (i32, i32) {
    %c0_i32 = arith.constant 0 : i32
    %c0_i32_0 = arith.constant 0 : i32
    %c0_i32_1 = arith.constant 0 : i32
    return %c0_i32, %c0_i32_0 : i32, i32
  }
  func.func @transform_7(%arg0: i32) -> (i32, i32, i32) {
    %c0_i32 = arith.constant 0 : i32
    %c0_i32_0 = arith.constant 0 : i32
    %c0_i32_1 = arith.constant 0 : i32
    return %arg0, %c0_i32, %c0_i32_0 : i32, i32, i32
  }
}

</mosaic_0001>

<bundles_post_ra>
// kernel: tpu_custom_call.1
= control target key start
LH: loop header
LB: loop body
LE: loop exit
PB: predicated region body
PF: predicated region fallthrough
CT: control target
= control target key end

     0   :  { %12 = vsyncpa [#allocation5], 0  ;;  %s1256_s0 = inlined_call_operand.vmem [shape: f32[4,4,128], index: 0, kind: input, shape index: {}]   ;;  %s1257_s1 = inlined_call_operand.vmem [shape: f32[2,8,4], index: 1, kind: input, shape index: {}]   ;;  %s1258_s2 = inlined_call_operand.vmem [shape: f32[16,4], index: 2, kind: input, shape index: {}]   ;;  %s1259_s3 = inlined_call_operand.vmem [shape: f32[8,1], index: 3, kind: input, shape index: {}]   ;;  %s1260_s4 = inlined_call_operand.vmem [shape: f32[3,8,8], index: 4, kind: input, shape index: {}]   ;;  %s1261_s5 = inlined_call_operand.vmem [shape: f32[8,1], index: 5, kind: input, shape index: {}]   ;;  %s1262_s6 = inlined_call_operand.vmem [shape: f32[8,1], index: 6, kind: input, shape index: {}]   ;;  %s1263_s7 = inlined_call_operand.hbm [shape: f32[4,8,128], index: 7, kind: output, shape index: {}]  }
   0x1   :  { %14 = vsyncpa [#allocation5 + $0x1], 0  ;;  %s1095_s24 = smov 0   ;;  %s1097_s25 = smov 0  }
   0x2   :  { %s1099_s26 = smov 0   ;;  %s1101_s27 = smov 0  }
   0x3 LB: > { %s1116_s28 = sadd.s32 4294967295, %s1047_s27   ;;  %s873_s29 = sadd.s32 4294967294, %s1047_s27   ;;  %s1047_s27 = sphi %s1101_s27, %s1269_s27   ;;  %s1043_s26 = sphi %s1099_s26, %s1268_s26   ;;  %s1039_s25 = sphi %s1097_s25, %s1267_s25   ;;  %s1035_s24 = sphi %s1095_s24, %s1266_s24  }
   0x4   : > { %s1120_s30 = sadd.s32 1, %s1047_s27   ;;  %s179_s8 = sadd.s32 1, %s1043_s26 }
   0x5   : > { %s176_s9 = ssub.s32 %s1047_s27, %s1120_s30  ;;  %p189_p0 = scmp.ne.s32.totalorder %s1043_s26, %s1039_s25 }
   0x6   : > { %p177_p1 = scmp.eq.s32.totalorder %s176_s9, 0  ;;  %p190_p2 = scmp.eq.s32.totalorder %s1116_s28, 3 }
   0x7   : > { %p195_p3 = scmp.ne.s32.totalorder %s1039_s25, %s1035_s24  ;;  %p196_p4 = scmp.eq.s32.totalorder %s873_s29, 3 }
   0x8   : > { %s1131_s10 = scalar_select %p177_p1, %s1043_s26, %s179_s8  }
   0x9   : > { %p1133_p5 = por %p190_p2, %p189_p0  ;;  %p1137_p6 = por %p196_p4, %p195_p3 }
   0xa   : > { %p876_p7 = scmp.ge.s32.totalorder %s1047_s27, 1  ;;  %p239_p8 = scmp.lt.s32.totalorder %s1047_s27, 5 }
   0xc   : > { %p240_p9 = pnand %p876_p7, %p239_p8 }
   0xd   : > { %p270_p10 = scmp.lt.s32.totalorder (!%p240_p9), %s1116_s28, 3  ;;  %v1049_v0 = vmov (!%p240_p9), 0.0   ;;  %vm1050_vm0 = vmmov (!%p240_p9), 0   ;;  %vm277_vm1 = vcmask (!%p240_p9), 31744   ;;  %v275_v1 = vld [vmem:[%s1258_s2] sm:$0xff] (!%p240_p9)  ;;  %v1051_v2 = vmov (!%p240_p9), 0  }
   0xe   : > { %243 = sbr.rel (%p240_p9) target bundleno = 744 (0x2e8), region = 48  ;;  %914 = vmatprep.subr.mxu1 (!%p240_p9), %v1049_v0  ;;  %916 = vmatprep.mubr.msk.f32.mxu1 (!%p240_p9), %vm1050_vm0, %v1049_v0  ;;  %v363_v3 = vld [vmem:[%s1259_s3] sm:$0xff] (!%p240_p9)  ;;  %vm284_vm2 = vcmask (!%p240_p9), 1043456   ;;  %v276_v6 = vld [vmem:[%s1258_s2 + $0x8] sm:$0xff] (!%p240_p9)  ;;  %s1052_s14 = smov (!%p240_p9), 4   ;;  %vm459_vm3 = vcmask (!%p240_p9), 1047584  }
   0xf   : > { %911 = vmatprep.mubr.msk.f32.mxu0 (!%p240_p9), %vm277_vm1, %v275_v1  ;;  %983 = vset.pattern.permute.xlu0 (!%p240_p9), %v1051_v2  ;;  %v379_v4 = vld [vmem:[%s1257_s1] sm:$0xff] (!%p240_p9)  ;;  %v884_v7 = vld [vmem:[%s1257_s1 + $0x8] sm:$0xff] (!%p240_p9)  ;;  %vm542_vm4 = vcmask (!%p240_p9), 1047568   ;;  %vm556_vm5 = vcmask (!%p240_p9), 64512   ;;  %v887_v25 = vld [vmem:[%s1260_s4 + $0x10] sm:$0xff] (!%p240_p9)  ;;  %s267_s29 = sand.u32 (!%p240_p9), 1, %s1039_s25  }
  0x10   : > { %366 = vperm.xlu0 (!%p240_p9), %983, %v363_v3   ;;  %984 = vset.pattern.permute.xlu1 (!%p240_p9), %v1051_v2  ;;  %v550_v16 = vld [vmem:[%s1261_s5] sm:$0xff] (!%p240_p9)  ;;  %v890_v26 = vld [vmem:[%s1260_s4 + $0x8] sm:$0xff] (!%p240_p9)  ;;  %s877_s8 = sshll.u32 (!%p240_p9), %s267_s29, 3  ;;  %s801_s20 = scalar_lea.sflag (!%p240_p9), [#allocation5], %s267_s29 }
  0x11   : > { %v631_v24 = vld [vmem:[%s1260_s4] sm:$0xff] (!%p240_p9)  ;;  %s269_s16 = scalar_lea.vmem (!%p240_p9), [#allocation4], %s877_s8 }
  0x12   : > { %v371_v31 = vld [vmem:[%s1262_s6] sm:$0xff] (!%p240_p9)  ;;  %s814_s17 = sshll.u32 (!%p240_p9), %s269_s16, 4  ;;  %s1214_s17 = int_to_ptr.vmem [resolvable:$true] %s814_s17 }
  0x15   : > { %s271_s15 = scalar_select %p270_p10, %s1116_s28, 3 }
  0x17   : > { %s878_s18 = sshll.u32 %s271_s15, 2  ;;  %s1053_s15 = smov 2  }
  0x18   : > { %s273_s21 = scalar_lea.vmem %s1256_s0, %s878_s18 }
  0x19   : > { %v274_v5 = vld [vmem:[%s273_s21] sm:$0xf]  ;;  %s985_s21 = scalar_lea.vmem %s1214_s17, 128 }
  0x1a   : > { %915 = vmatpush3.msk.msra.mxu1 %vm284_vm2, %v274_v5  ;;  %909 = vmatprep.subr.msk.mxu0 %vm284_vm2, %v274_v5  ;;  %p986_p11 = scmp.ne.s32.totalorder %s1214_s17, %s985_s21 }
  0x1b   : > { %917 = vmatmul.mubr.msk.f32.vlgmr.msra.gmra.mrb[0].mxu1 %vm277_vm1, %v379_v4  ;;  %910 = vmatpush3.msk.msra.mxu0 %vm284_vm2, %v274_v5 }
  0x1c   : > { %912 = vmatmul.mubr.msk.f32.vlgmr.msra.gmra.mrb[0].mxu0 %vm277_vm1, %v276_v6  ;;  %919 = vmatprep.subr.mxu0 %v1049_v0  ;;  %p987_p12 = pnand %p986_p11, %p1133_p5 }
  0x1d   : > { %920 = vmatpush3.msk.msra.mxu0 %vm284_vm2, %v274_v5  ;;  %921 = vmatprep.mubr.msk.f32.mxu0 %vm1050_vm0, %v1049_v0 }
  0x1e   : > { %924 = vmatprep.subr.mxu1 %v1049_v0  ;;  %929 = vmatprep.subr.mxu0 %v1049_v0  ;;  %p988_p13 = pneg %p987_p12 }
  0x1f   : > { %926 = vmatprep.mubr.msk.f32.mxu1 %vm1050_vm0, %v1049_v0 }
  0x20   : > { %922 = vmatmul.mubr.msk.f32.vlgmr.msra.gmra.mrb[2].mxu0 %vm277_vm1, %v884_v7 }
  0x21   : > { %931 = vmatprep.mubr.msk.f32.mxu0 %vm1050_vm0, %v1049_v0 }
  0x8f   : > { %v367_v9 = vpop.permute.xlu0 %366 }
  0xee   : > { %v449_v8 = vpop.f32.mrb[0].mxu1 }
  0xef   : > { %455 = vrot.lane.b32.xlu0 %v449_v8, %s1052_s14  ;;  %v918_v10 = vpop.f32.mrb[1].mxu1  ;;  %v913_v11 = vpop.f32.mrb[0].mxu0 }
  0xf0   : > { %v354_v12 = vpop.f32.mrb[1].mxu0 }
  0xf1   : > { %v369_v13 = vadd.f32 %v367_v9, %v354_v12 }
  0xf3   : > { %370 = vst [vmem:[#allocation2] sm:$0xff] %v369_v13  ;;  %v532_v14 = vpop.f32.mrb[2].mxu0 }
  0xf4   : > { %v923_v15 = vpop.f32.mrb[3].mxu0  ;;  %538 = vrot.lane.b32.xlu1 %v532_v14, %s1053_s15 }
  0xf8   : > { %553 = vperm.xlu1 %984, %v550_v16  }
 0x161   : > { %v456_v17 = vpop.permute.xlu0 %455 }
 0x162   : > { %v458_v18 = vadd.f32 %v456_v17, %v369_v13 }
 0x164   : > { %460 = vst.msk [vmem:[#allocation2] sm:$0xff] %vm459_vm3, %v458_v18 }
 0x166   : > { %v539_v19 = vpop.permute.xlu1 %538 }
 0x16b   : > { %v536_v20 = vld [vmem:[#allocation2] sm:$0xff] }
 0x16c   : > { %v541_v21 = vadd.f32 %v539_v19, %v536_v20 }
 0x16e   : > { %543 = vst.msk [vmem:[#allocation2] sm:$0xff] %vm542_vm4, %v541_v21 }
 0x175   : > { %v544_v22 = vld [vmem:[#allocation2] sm:$0xff] }
 0x176   : > { %v545_v23 = vmax.f32 %v544_v22, 0.0 }
 0x177   : > { %v554_v27 = vpop.permute.xlu1 %553 }
 0x178   : > { %546 = vst [vmem:[#allocation2] sm:$0xff] %v545_v23  ;;  %925 = vmatpush3.msra.mxu1 %v545_v23  ;;  %930 = vmatpush3.msra.mxu0 %v545_v23 }
 0x179   : > { %932 = vmatmul.mubr.msk.f32.vlgmr.msra.gmra.mrb[4].mxu0 %vm556_vm5, %v631_v24  ;;  %934 = vmatprep.subr.mxu1 %v1049_v0 }
 0x17a   : > { %927 = vmatmul.mubr.msk.f32.vlgmr.msra.gmra.mrb[2].mxu1 %vm556_vm5, %v887_v25 }
 0x17b   : > { %935 = vmatpush3.msra.mxu1 %v545_v23  ;;  %936 = vmatprep.mubr.msk.f32.mxu1 %vm1050_vm0, %v1049_v0 }
 0x17e   : > { %937 = vmatmul.mubr.msk.f32.vlgmr.msra.gmra.mrb[4].mxu1 %vm556_vm5, %v890_v26 }
 0x24c   : > { %v701_v28 = vpop.f32.mrb[4].mxu0 }
 0x24d   : > { %707 = vrot.lane.b32.xlu0 %v701_v28, %s1052_s14  ;;  %v933_v29 = vpop.f32.mrb[5].mxu0  ;;  %v626_v30 = vpop.f32.mrb[2].mxu1  ;;  %s893_s14 = sshll.u32 %s1116_s28, 7  ;;  %s1054_s28 = smov [#allocation4]  }
 0x24e   : > { %v627_v32 = vadd.f32 %v626_v30, %v554_v27  ;;  %v928_v33 = vpop.f32.mrb[3].mxu1  ;;  %s1212_s19 = scalar_lea.hbm %s1263_s7, %s893_s14  ;;  %s989_s22 = sshll.u32 %s1054_s28, 4  ;;  %s990_s22 = int_to_ptr.vmem [resolvable:$false] %s989_s22 }
 0x24f   : > { %s991_s23 = scalar_lea.vmem %s990_s22, 256  ;;  %p992_p0 = scmp.lt.s32.totalorder %s1214_s17, %s990_s22 }
 0x250   : > { %630 = vst [vmem:[%s269_s16] sm:$0xff] %v627_v32  ;;  %p993_p1 = scmp.lt.s32.totalorder %s991_s23, %s985_s21 }
 0x251   : > { %374 = vperm.xlu0 %983, %v371_v31   ;;  %v783_v34 = vpop.f32.mrb[4].mxu1 }
 0x252   : > { %789 = vrot.lane.b32.xlu1 %v783_v34, %s1053_s15  ;;  %v938_v35 = vpop.f32.mrb[5].mxu1  ;;  %p994_p2 = por %p993_p1, %p992_p0 }
 0x254   : > { %p995_p3 = pnand %p994_p2, %p988_p13 }
 0x2bf   : > { %v708_v36 = vpop.permute.xlu0 %707 }
 0x2c0   : > { %v710_v37 = vadd.f32 %v708_v36, %v627_v32 }
 0x2c2   : > { %711 = vst.msk [vmem:[%s269_s16] sm:$0xff] %vm459_vm3, %v710_v37 }
 0x2c4   : > { %v790_v38 = vpop.permute.xlu1 %789 }
 0x2c9   : > { %v787_v39 = vld [vmem:[%s269_s16] sm:$0xff] }
 0x2ca   : > { %v792_v40 = vadd.f32 %v790_v38, %v787_v39 }
 0x2cc   : > { %793 = vst.msk [vmem:[%s269_s16] sm:$0xff] %vm542_vm4, %v792_v40 }
 0x2d0   : > { %v375_v41 = vpop.permute.xlu0 %374 }
 0x2d1   : > { %v377_v43 = vadd.f32 %v913_v11, %v375_v41 }
 0x2d3   : > { %v794_v42 = vld [vmem:[%s269_s16] sm:$0xff] }
 0x2d4   : > { %v795_v44 = vmax.f32 %v794_v42, 0.0 }
 0x2d6   : > { %v797_v45 = vadd.f32 %v795_v44, %v377_v43 }
 0x2d8   : > { %v798_v46 = vmax.f32 %v797_v45, 0.0 }
 0x2da   : > { %799 = vst [vmem:[%s269_s16] sm:$0xff] %v798_v46 }
 0x2db   : > { %998 = shalt.err (!%p995_p3)
}
 0x2dc   : > { %s999_s29 = scalar_lea.hbm %s1212_s19, 128  ;;  %s1003_s13 = scalar_lea.hbm %s1263_s7, 512 }
 0x2dd   : > { %p1000_p4 = scmp.ne.s32.totalorder %s1212_s19, %s999_s29  ;;  %p1004_p9 = scmp.lt.u32.totalorder %s1212_s19, %s1263_s7 }
 0x2de   : > { %p1005_p10 = scmp.lt.u32.totalorder %s1003_s13, %s999_s29  ;;  %p1007_p12 = scmp.lt.u32.totalorder %s999_s29, %s1212_s19 }
 0x2df   : > { %p1001_p7 = pnand %p1000_p4, %p1133_p5 }
 0x2e0   : > { %p1006_p11 = por %p1005_p10, %p1004_p9 }
 0x2e1   : > { %p1002_p8 = pneg %p1001_p7 }
 0x2e2   : > { %p1008_p13 = por %p1007_p12, %p1006_p11 }
 0x2e4   : > { %p1009_p0 = pnand %p1008_p13, %p1002_p8 }
 0x2e6   : > { %1012 = shalt.err (!%p1009_p0)
}
 0x2e7   : > { %939 = dma.vmem_to_hbm [thread:$0]  (%p1133_p5), %s1214_s17, 128, %s1212_s19, %s801_s20  }
 0x2e8 PF: > { %p945_p1 = scmp.ge.s32.totalorder %s1047_s27, 2  ;;  %s826_s15 = sand.u32 1, %s1035_s24  }
 0x2e9   : > { %s827_s18 = scalar_lea.sflag [#allocation5], %s826_s15 }
 0x2ea   : > { %p942_p2 = pnand %p945_p1, %p1137_p6 }
 0x2ec   : > { %1030 = dma.done.wait (!%p942_p2), %s827_s18, 128  }
 0x2ed   : > { %1032 = vsyncadd (!%p942_p2), %s827_s18, 4294967168  ;;  %p17_p3 = scmp.ge.s32.totalorder %s1120_s30, 6   ;;  %s1266_s24 = smov %s1039_s25 }
 0x2ee   : > { %s1267_s25 = smov %s1043_s26  ;;  %s1268_s26 = smov %s1131_s10 }
 0x2ef   : > { %s1269_s27 = smov %s1120_s30  ;;  %19 = sbr.rel (!%p17_p3) target bundleno = 3 (0x3), region = 86 }
 0x2f6   :  { %832 = vsyncpa [#allocation5], 1 }
 0x2f7   :  { %834 = vsyncpa [#allocation5 + $0x1], 1 }

</bundles_post_ra>
